<compile_context>
chip_gen: v7x
topology: tpu7x:2x2x1
jax: 0.10.0
libtpu: 0.0.40
codegen_flags: <defaults>
</compile_context>

<pallas_src>
import jax
import jax.numpy as jnp
from jax.experimental import pallas as pl
from jax.experimental.pallas import tpu as pltpu


def _ce_lse_kernel(x_ref, ones_ref, lse_ref, m_sc, l_sc):
    """Streaming logsumexp over class tiles for one batch tile.

    Grid = (batch_tiles, class_tiles); the class axis (innermost) is the
    reduction axis.  m_sc holds the running max (f32, (TN,1)); l_sc holds the
    running sum replicated across 128 lanes (f32, (TN,128)).  The per-row LSE
    is written on the LAST class step only — the out index_map must stay
    constant in j for this to be correct.
    """
    j = pl.program_id(1)

    @pl.when(j == 0)
    def _():
        m_sc[...] = jnp.full_like(m_sc, -jnp.inf)
        l_sc[...] = jnp.zeros_like(l_sc)

    use_bf16 = jnp.dtype(x_ref.dtype) == jnp.dtype(jnp.bfloat16)
    x = x_ref[...]                                   # (TN, TC) native dtype
    xc = x if use_bf16 else x.astype(jnp.float32)    # compute dtype

    m_prev = m_sc[...]                                               # (TN, 1)
    m_tile = jnp.max(xc, axis=-1, keepdims=True).astype(jnp.float32)
    m_new = jnp.maximum(m_prev, m_tile)                              # (TN, 1)

    # m_new is a max of compute-dtype values, so casting it back to the
    # compute dtype for the subtraction is exact -> consistent with the
    # +m_sc add-back at finalize (logsumexp shift identity).
    p = jnp.exp(xc - m_new.astype(xc.dtype))                         # (TN, TC)

    if use_bf16:
        # Class-axis sum on the otherwise idle MXU; every output lane carries
        # the same row sum (values are <= 1, f32 accumulation).
        p_sum = jnp.dot(p, ones_ref[...], preferred_element_type=jnp.float32)
    else:
        p_sum = jnp.sum(p, axis=-1, keepdims=True)                   # (TN, 1)

    alpha = jnp.exp(m_prev - m_new)                                  # (TN, 1)
    l_sc[...] = l_sc[...] * alpha + p_sum
    m_sc[...] = m_new

    @pl.when(j == pl.num_programs(1) - 1)
    def _():
        lse_ref[...] = m_sc[...] + jnp.log(l_sc[...])                # (TN,128)


def _round_up(x, m):
    return (x + m - 1) // m * m


def _vmem_capacity_bytes():
    try:
        return int(pltpu.get_tpu_info().vmem_capacity_bytes)
    except Exception:
        return 64 * 1024 * 1024  # conservative (v7x per-TC capacity)


def ce_loss(logits, target, *, batch_tile=None, class_tile=None):
    """Cross-entropy loss (mean reduction) over (N, C) logits, (N,) int targets."""
    n, c = logits.shape
    in_dtype = logits.dtype
    itemsize = jnp.dtype(in_dtype).itemsize
    is_bf16 = jnp.dtype(in_dtype) == jnp.dtype(jnp.bfloat16)
    compute_dtype = jnp.bfloat16 if is_bf16 else jnp.float32
    compute_itemsize = jnp.dtype(compute_dtype).itemsize
    row_align = 16 if itemsize == 2 else (32 if itemsize == 1 else 8)

    # ---- class tile (lane axis): multiple of 128, ~2K target for big C -----
    if class_tile is None:
        c_pad128 = _round_up(c, 128)
        class_tile = c_pad128 if c_pad128 <= 4096 else 2048
    assert class_tile % 128 == 0, "class_tile must be a multiple of 128"
    c_padded = _round_up(c, class_tile)

    # ---- batch tile from a chip-queried VMEM budget -------------------------
    vmem_cap = _vmem_capacity_bytes()
    vmem_limit = min(vmem_cap // 2, 64 * 1024 * 1024)
    fixed = 2 * class_tile * 128 * compute_itemsize + (2 << 20)  # ones + headroom
    per_row = (2 * class_tile * itemsize             # double-buffered logits tile
               + 3 * class_tile * compute_itemsize   # x-m / exp / dot staging temps
               + 2 * 128 * 4                         # m_sc + l_sc (lane-padded f32)
               + 2 * 128 * 4)                        # double-buffered out block
    budget = max(0, (vmem_limit - fixed) * 4 // 5)   # 20% safety margin
    if batch_tile is None:
        max_rows = max(row_align, budget // per_row // row_align * row_align)
        batch_tile = min(max_rows, 1024, _round_up(n, row_align))
    assert batch_tile % 8 == 0, "batch_tile must be a multiple of 8"
    n_padded = _round_up(n, batch_tile)

    # ---- pad ragged N / C (padded classes get finfo.min -> exp() == 0) ------
    pad_val = float(jnp.finfo(in_dtype).min)
    x = logits
    if (n_padded, c_padded) != (n, c):
        x = jnp.pad(x, ((0, n_padded - n), (0, c_padded - c)),
                    constant_values=pad_val)

    ones = jnp.ones((class_tile, 128), compute_dtype)
    grid = (n_padded // batch_tile, c_padded // class_tile)

    lse = pl.pallas_call(
        _ce_lse_kernel,
        out_shape=jax.ShapeDtypeStruct((n_padded, 128), jnp.float32),
        grid_spec=pltpu.PrefetchScalarGridSpec(
            num_scalar_prefetch=0,
            grid=grid,
            in_specs=[
                pl.BlockSpec((batch_tile, class_tile), lambda i, j: (i, j)),
                pl.BlockSpec((class_tile, 128), lambda i, j: (0, 0)),
            ],
            out_specs=pl.BlockSpec((batch_tile, 128), lambda i, j: (i, 0)),
            scratch_shapes=[
                pltpu.VMEM((batch_tile, 1), jnp.float32),    # running max m
                pltpu.VMEM((batch_tile, 128), jnp.float32),  # running sum l
            ],
        ),
        compiler_params=pltpu.CompilerParams(
            dimension_semantics=("parallel", "arbitrary"),
            vmem_limit_bytes=int(vmem_limit),
        ),
    )(x, ones)

    # O(N) gather of the target logits + mean reduction in the wrapper.
    lse_rows = lse[:n, 0]
    idx = target.astype(jnp.int32)[:, None]
    picked = jnp.take_along_axis(logits, idx, axis=-1).astype(jnp.float32)[:, 0]
    return jnp.mean(lse_rows - picked)


def _reference_ce(logits, target):
    x = logits.astype(jnp.float32)
    lse = jax.scipy.special.logsumexp(x, axis=-1)
    picked = jnp.take_along_axis(x, target[:, None].astype(jnp.int32), axis=-1)[:, 0]
    return jnp.mean(lse - picked)


if __name__ == "__main__":
    key = jax.random.PRNGKey(0)
    k1, k2, k3, k4, k5, k6 = jax.random.split(key, 6)

    # Small primary case, matching the module's (N, C) forward.
    N, C = 8, 32
    logits = jax.random.normal(k1, (N, C), dtype=jnp.float32)
    target = jax.random.randint(k2, (N,), 0, C, dtype=jnp.int32)
    loss = ce_loss(logits, target)
    jax.block_until_ready(loss)
    ref = _reference_ce(logits, target)
    assert jnp.allclose(loss, ref, atol=1e-5, rtol=1e-5), (loss, ref)

    # bf16 logits, multiple batch tiles, streaming logsumexp over 3 class
    # tiles (exercises the bf16 VPU/EUP path and the MXU class-axis sum).
    N2, C2 = 64, 384
    logits2 = jax.random.normal(k3, (N2, C2), dtype=jnp.float32).astype(jnp.bfloat16)
    target2 = jax.random.randint(k4, (N2,), 0, C2, dtype=jnp.int32)
    loss2 = ce_loss(logits2, target2, batch_tile=32, class_tile=128)
    jax.block_until_ready(loss2)
    ref2 = _reference_ce(logits2, target2)
    assert jnp.allclose(loss2, ref2, atol=1e-3, rtol=1e-3), (loss2, ref2)

    # Ragged N / C (exercises the row / column padding paths).
    N3, C3 = 10, 200
    logits3 = jax.random.normal(k5, (N3, C3), dtype=jnp.float32)
    target3 = jax.random.randint(k6, (N3,), 0, C3, dtype=jnp.int32)
    loss3 = ce_loss(logits3, target3)
    jax.block_until_ready(loss3)
    ref3 = _reference_ce(logits3, target3)
    assert jnp.allclose(loss3, ref3, atol=1e-5, rtol=1e-5), (loss3, ref3)

    print("KERNEL_OK")
</pallas_src>

<mosaic_0001>
module attributes {stable_mosaic.version = 11 : i64} {
  func.func @_ce_lse_kernel(%arg0: i32, %arg1: i32, %arg2: memref<8x128xf32, #tpu.memory_space<vmem>>, %arg3: memref<128x128xf32, #tpu.memory_space<vmem>>, %arg4: memref<8x128xf32, #tpu.memory_space<vmem>>, %arg5: memref<8x1xf32, #tpu.memory_space<vmem>>, %arg6: memref<8x128xf32, #tpu.memory_space<vmem>>) attributes {dimension_semantics = [#tpu.dimension_semantics<parallel>, #tpu.dimension_semantics<arbitrary>], iteration_bounds = array<i64: 1, 1>, scalar_prefetch = 0 : i64, scratch_operands = 2 : i64, tpu.core_type = #tpu.core_type<tc>, window_params = [{transform_indices = @transform_0, window_bounds = array<i64: 8, 128>}, {pipeline_mode = #tpu.pipeline_mode<synchronous>, transform_indices = @transform_1, window_bounds = array<i64: 128, 128>}, {transform_indices = @transform_2, window_bounds = array<i64: 8, 128>}]} {
    %c0_i32 = arith.constant 0 : i32
    %0 = arith.cmpi eq, %arg1, %c0_i32 : i32
    %1 = arith.extui %0 : i1 to i32
    %c0_i32_0 = arith.constant 0 : i32
    %2 = arith.cmpi ne, %1, %c0_i32_0 : i32
    scf.if %2 {
      %cst_13 = arith.constant 0xFF800000 : f32
      %25 = vector.broadcast %cst_13 : f32 to vector<8x1xf32>
      %c0_14 = arith.constant 0 : index
      %c0_15 = arith.constant 0 : index
      %26 = vector.load %arg5[%c0_14, %c0_15] : memref<8x1xf32, #tpu.memory_space<vmem>>, vector<8x1xf32>
      tpu.vector_store %arg5[%c0_14, %c0_15], %25 {strides = array<i32>} : memref<8x1xf32, #tpu.memory_space<vmem>>, vector<8x1xf32>,
      %cst_16 = arith.constant 0.000000e+00 : f32
      %27 = vector.broadcast %cst_16 : f32 to vector<8x128xf32>
      %c0_17 = arith.constant 0 : index
      %c0_18 = arith.constant 0 : index
      %28 = vector.load %arg6[%c0_17, %c0_18] : memref<8x128xf32, #tpu.memory_space<vmem>>, vector<8x128xf32>
      tpu.vector_store %arg6[%c0_17, %c0_18], %27 {strides = array<i32>} : memref<8x128xf32, #tpu.memory_space<vmem>>, vector<8x128xf32>,
    } else {
    }
    %c0 = arith.constant 0 : index
    %c0_1 = arith.constant 0 : index
    %3 = vector.load %arg2[%c0, %c0_1] : memref<8x128xf32, #tpu.memory_space<vmem>>, vector<8x128xf32>
    %c0_2 = arith.constant 0 : index
    %c0_3 = arith.constant 0 : index
    %4 = vector.load %arg5[%c0_2, %c0_3] : memref<8x1xf32, #tpu.memory_space<vmem>>, vector<8x1xf32>
    %cst = arith.constant dense<0xFF800000> : vector<8xf32>
    %5 = vector.multi_reduction <maximumf>, %3, %cst [1] : vector<8x128xf32> to vector<8xf32>
    %6 = vector.shape_cast %5 : vector<8xf32> to vector<8x1xf32>
    %7 = arith.maximumf %4, %6 : vector<8x1xf32>
    %8 = vector.broadcast %7 : vector<8x1xf32> to vector<8x128xf32>
    %9 = arith.subf %3, %8 : vector<8x128xf32>
    %10 = math.exp %9 : vector<8x128xf32>
    %cst_4 = arith.constant dense<0.000000e+00> : vector<8xf32>
    %11 = vector.multi_reduction <add>, %10, %cst_4 [1] : vector<8x128xf32> to vector<8xf32>
    %12 = vector.shape_cast %11 : vector<8xf32> to vector<8x1xf32>
    %13 = arith.subf %4, %7 : vector<8x1xf32>
    %14 = math.exp %13 : vector<8x1xf32>
    %c0_5 = arith.constant 0 : index
    %c0_6 = arith.constant 0 : index
    %15 = vector.load %arg6[%c0_5, %c0_6] : memref<8x128xf32, #tpu.memory_space<vmem>>, vector<8x128xf32>
    %16 = vector.broadcast %14 : vector<8x1xf32> to vector<8x128xf32>
    %17 = arith.mulf %15, %16 : vector<8x128xf32>
    %18 = vector.broadcast %12 : vector<8x1xf32> to vector<8x128xf32>
    %19 = arith.addf %17, %18 : vector<8x128xf32>
    %c0_7 = arith.constant 0 : index
    %c0_8 = arith.constant 0 : index
    %20 = vector.load %arg6[%c0_7, %c0_8] : memref<8x128xf32, #tpu.memory_space<vmem>>, vector<8x128xf32>
    tpu.vector_store %arg6[%c0_7, %c0_8], %19 {strides = array<i32>} : memref<8x128xf32, #tpu.memory_space<vmem>>, vector<8x128xf32>,
    %c0_9 = arith.constant 0 : index
    %c0_10 = arith.constant 0 : index
    %21 = vector.load %arg5[%c0_9, %c0_10] : memref<8x1xf32, #tpu.memory_space<vmem>>, vector<8x1xf32>
    tpu.vector_store %arg5[%c0_9, %c0_10], %7 {strides = array<i32>} : memref<8x1xf32, #tpu.memory_space<vmem>>, vector<8x1xf32>,
    %c0_i32_11 = arith.constant 0 : i32
    %22 = arith.cmpi eq, %arg1, %c0_i32_11 : i32
    %23 = arith.extui %22 : i1 to i32
    %c0_i32_12 = arith.constant 0 : i32
    %24 = arith.cmpi ne, %23, %c0_i32_12 : i32
    scf.if %24 {
      %c0_13 = arith.constant 0 : index
      %c0_14 = arith.constant 0 : index
      %25 = vector.load %arg5[%c0_13, %c0_14] : memref<8x1xf32, #tpu.memory_space<vmem>>, vector<8x1xf32>
      %c0_15 = arith.constant 0 : index
      %c0_16 = arith.constant 0 : index
      %26 = vector.load %arg6[%c0_15, %c0_16] : memref<8x128xf32, #tpu.memory_space<vmem>>, vector<8x128xf32>
      %27 = math.log %26 : vector<8x128xf32>
      %28 = vector.broadcast %25 : vector<8x1xf32> to vector<8x128xf32>
      %29 = arith.addf %28, %27 : vector<8x128xf32>
      %c0_17 = arith.constant 0 : index
      %c0_18 = arith.constant 0 : index
      %30 = vector.load %arg4[%c0_17, %c0_18] : memref<8x128xf32, #tpu.memory_space<vmem>>, vector<8x128xf32>
      tpu.vector_store %arg4[%c0_17, %c0_18], %29 {strides = array<i32>} : memref<8x128xf32, #tpu.memory_space<vmem>>, vector<8x128xf32>,
    } else {
    }
    return
  }
  func.func @transform_0(%arg0: i32, %arg1: i32) -> (i32, i32) {
    %c0_i32 = arith.constant 0 : i32
    return %arg0, %arg1 : i32, i32
  }
  func.func @transform_1(%arg0: i32, %arg1: i32) -> (i32, i32) {
    %c0_i32 = arith.constant 0 : i32
    %c0_i32_0 = arith.constant 0 : i32
    %c0_i32_1 = arith.constant 0 : i32
    return %c0_i32, %c0_i32_0 : i32, i32
  }
  func.func @transform_2(%arg0: i32, %arg1: i32) -> (i32, i32) {
    %c0_i32 = arith.constant 0 : i32
    %c0_i32_0 = arith.constant 0 : i32
    return %arg0, %c0_i32 : i32, i32
  }
}

</mosaic_0001>

<bundles_post_ra>
// kernel: tpu_custom_call.1
= control target key start
LH: loop header
LB: loop body
LE: loop exit
PB: predicated region body
PF: predicated region fallthrough
CT: control target
= control target key end

     0   :  { %7 = vsyncpa [#allocation5], 0  ;;  %s256_s0 = inlined_call_operand.hbm [shape: f32[8,128], index: 0, kind: input, shape index: {}]   ;;  %s257_s1 = inlined_call_operand.hbm [shape: f32[128,128], index: 1, kind: input, shape index: {}]   ;;  %s258_s2 = inlined_call_operand.hbm [shape: f32[8,128], index: 2, kind: output, shape index: {}]  }
   0x1   :  { %8 = vsyncpa [#allocation8], 0 }
   0x2   :  { %9 = vsyncpa [#allocation6], 0  ;;  %s191_s9 = smov [#allocation4]   ;;  %s192_s11 = smov [#allocation7]  }
   0x3   :  { %s16_s10 = sshll.u32 %s191_s9, 4  ;;  %s25_s12 = sshll.u32 %s192_s11, 4  ;;  %s17_s10 = int_to_ptr.vmem [resolvable:$true] %s16_s10  ;;  %s213_s12 = int_to_ptr.vmem [resolvable:$true] %s25_s12 }
   0x4   :  { %s119_s15 = scalar_lea.hbm %s256_s0, 128 }
   0x5   :  { %p120_p0 = scmp.ne.s32.totalorder %s256_s0, %s119_s15  ;;  %p123_p1 = scmp.lt.u32.totalorder %s119_s15, %s256_s0 }
   0x7   :  { %p125_p2 = pnand %p123_p1, %p120_p0 }
   0x9   :  { %128 = shalt.err (!%p125_p2)
}
   0xa   :  { %s129_s20 = scalar_lea.vmem %s17_s10, 128  ;;  %p134_p4 = scmp.lt.s32.totalorder %s17_s10, %s17_s10 }
   0xb   :  { %p130_p3 = scmp.ne.s32.totalorder %s17_s10, %s129_s20  ;;  %p135_p5 = scmp.lt.s32.totalorder %s129_s20, %s129_s20 }
   0xd   :  { %p136_p6 = por %p135_p5, %p134_p4 }
   0xf   :  { %p137_p7 = pnand %p136_p6, %p130_p3 }
  0x11   :  { %140 = shalt.err (!%p137_p7)
}
  0x12   :  { %19 = dma.hbm_to_vmem [thread:$0]  %s256_s0, 128, %s17_s10, [#allocation5]  }
  0x13   :  { %s141_s25 = scalar_lea.hbm %s257_s1, 2048 }
  0x14   :  { %p142_p8 = scmp.ne.s32.totalorder %s257_s1, %s141_s25  ;;  %p145_p9 = scmp.lt.u32.totalorder %s141_s25, %s257_s1 }
  0x16   :  { %p147_p10 = pnand %p145_p9, %p142_p8 }
  0x18   :  { %150 = shalt.err (!%p147_p10)
}
  0x19   :  { %s151_s30 = scalar_lea.vmem %s213_s12, 2048  ;;  %p156_p12 = scmp.lt.s32.totalorder %s213_s12, %s213_s12 }
  0x1a   :  { %p152_p11 = scmp.ne.s32.totalorder %s213_s12, %s151_s30  ;;  %p157_p13 = scmp.lt.s32.totalorder %s151_s30, %s151_s30 }
  0x1c   :  { %p158_p0 = por %p157_p13, %p156_p12 }
  0x1e   :  { %p159_p1 = pnand %p158_p0, %p152_p11 }
  0x20   :  { %162 = shalt.err (!%p159_p1)
}
  0x21   :  { %s193_s0 = smov 128   ;;  %s194_s3 = smov 8  }
  0x22   :  { %31 = dma.hbm_to_vmem [thread:$0]  %s257_s1, 2048, %s213_s12, [#allocation8], %s193_s0, %s193_s0, %s194_s3  }
  0x23   :  { %185 = dma.done.wait [#allocation5], 128  }
  0x24   :  { %186 = vsyncadd [#allocation5], 4294967168 }
  0x25   :  { %187 = dma.done.wait [#allocation8], 2048  }
  0x26   :  { %188 = vsyncadd [#allocation8], 4294965248  ;;  %vm42_vm0 = vcmask 7168   ;;  %v195_v0 = vmov -inf   ;;  %v45_v1 = vld [vmem:[#allocation4] sm:$0xff]  ;;  %v196_v2 = vmov 0  }
  0x27   :  { %43 = vst.msk [vmem:[#allocation2] sm:$0xff] %vm42_vm0, %v195_v0  ;;  %47 = vmax.xlane.f32.xlu0 %v45_v1  ;;  %112 = vset.pattern.permute.xlu1 %v196_v2  ;;  %s197_s1 = smov [#allocation9]  }
  0x28   :  { %111 = vset.pattern.permute.xlu0 %v196_v2  ;;  %s94_s6 = sshll.u32 %s197_s1, 4  ;;  %s95_s6 = int_to_ptr.vmem [resolvable:$true] %s94_s6 }
  0x29   :  { %s163_s7 = scalar_lea.vmem %s95_s6, 128  ;;  %p168_p3 = scmp.lt.s32.totalorder %s95_s6, %s95_s6 }
  0x2a   :  { %p164_p2 = scmp.ne.s32.totalorder %s95_s6, %s163_s7  ;;  %p169_p4 = scmp.lt.s32.totalorder %s163_s7, %s163_s7 }
  0x2c   :  { %p170_p5 = por %p169_p4, %p168_p3 }
  0x2e   :  { %v46_v3 = vld [vmem:[#allocation2] sm:$0xff]  ;;  %p171_p6 = pnand %p170_p5, %p164_p2 }
  0xb4   :  { %v48_v4 = vpop.xlane.xlu0 %47 }
  0xb5   :  { %v49_v5 = vmax.f32 %v46_v3, %v48_v4 }
  0xb7   :  { %v60_v6 = vsub.f32 %v46_v3, %v49_v5  ;;  %73 = vst.msk [vmem:[#allocation2] sm:$0xff] %vm42_vm0, %v49_v5  ;;  %52 = vperm.xlu0 %111, %v49_v5  }
  0xb9   :  { %v61_v7 = vmul.f32 1.442695, %v60_v6 }
  0xbb   :  { %113 = vpow2.f32 %v61_v7 }
  0xbe   :  { %v77_v13 = vld [vmem:[#allocation2] sm:$0xff] }
  0xc5   :  { %v114_v8 = vpop.eup %113 }
  0xc6   :  { %66 = vperm.xlu1 %112, %v114_v8  }
 0x136   :  { %v53_v9 = vpop.permute.xlu0 %52 }
 0x137   :  { %v55_v10 = vsub.f32 %v45_v1, %v53_v9 }
 0x139   :  { %v56_v11 = vmul.f32 1.442695, %v55_v10 }
 0x13b   :  { %115 = vpow2.f32 %v56_v11 }
 0x145   :  { %v116_v12 = vpop.eup %115  ;;  %v67_v14 = vpop.permute.xlu1 %66 }
 0x146   :  { %58 = vadd.xlane.f32.xlu1 %v116_v12  ;;  %v69_v15 = vmul.f32 0.0, %v67_v14 }
 0x157   :  { %83 = vperm.xlu1 %112, %v77_v13  }
 0x1d3   :  { %v59_v16 = vpop.xlane.xlu1 %58 }
 0x1d4   :  { %v70_v17 = vadd.f32 %v69_v15, %v59_v16 }
 0x1d6   :  { %117 = vlog2.f32 %v70_v17 }
 0x1d7   :  { %v84_v20 = vpop.permute.xlu1 %83 }
 0x1e0   :  { %v118_v18 = vpop.eup %117 }
 0x1e1   :  { %v80_v19 = vmul.f32 0.6931472, %v118_v18 }
 0x1e3   :  { %v86_v21 = vadd.f32 %v84_v20, %v80_v19 }
 0x1e5   :  { %87 = vst [vmem:[#allocation9] sm:$0xff] %v86_v21 }
 0x1e6   :  { %174 = shalt.err (!%p171_p6)
}
 0x1e7   :  { %s175_s10 = scalar_lea.hbm %s258_s2, 128 }
 0x1e8   :  { %p176_p7 = scmp.ne.s32.totalorder %s258_s2, %s175_s10  ;;  %p179_p8 = scmp.lt.u32.totalorder %s175_s10, %s258_s2 }
 0x1ea   :  { %p181_p9 = pnand %p179_p8, %p176_p7 }
 0x1ec   :  { %184 = shalt.err (!%p181_p9)
}
 0x1ed   :  { %97 = dma.vmem_to_hbm [thread:$0]  %s95_s6, 128, %s258_s2, [#allocation6]  }
 0x1ee   :  { %189 = dma.done.wait [#allocation6], 128  }
 0x1ef   :  { %190 = vsyncadd [#allocation6], 4294967168 }
 0x1f0   :  { %101 = vsyncpa [#allocation5], 1 }
 0x1f1   :  { %102 = vsyncpa [#allocation8], 1 }
 0x1f2   :  { %103 = vsyncpa [#allocation6], 1 }

</bundles_post_ra>
